<compile_context>
chip_gen: v7x
topology: tpu7x:2x2x1
jax: 0.10.0
libtpu: 0.0.40
codegen_flags: <defaults>
</compile_context>

<pallas_src>
import jax
import jax.numpy as jnp
from jax.experimental import pallas as pl
from jax.experimental.pallas import tpu as pltpu


def _round_up(a, b):
    return (a + b - 1) // b * b


def _choose_tile_n(n, c, itemsize, target_block_bytes=2 << 20, max_rows=64 * 1024):
    """Pick a row tile so each x block is ~2 MiB (clamped to [8, 64K] rows)."""
    rows = max(1, target_block_bytes // max(1, c * itemsize))
    rows = min(rows, max_rows)
    rows = min(rows, _round_up(n, 8))        # never larger than the batch
    return max(8, _round_up(rows, 8))        # sublane-aligned


def _e3outlier_kernel(n_ref, x_ref, t_ref, err_sum_ref, uni_ref):
    """Per-tile cross-entropy partial sum + per-row uniformity error.

    n_ref:       (1,)        int32 in SMEM -> true batch size (scalar prefetch)
    x_ref:       (TILE_N, C) logits, native dtype (upcast to f32 in-kernel)
    t_ref:       (TILE_N, 1) int32 target class indices
    err_sum_ref: (1, 1, 1)   f32  -> sum over valid rows of logsumexp(x) - x[target]
    uni_ref:     (TILE_N, 1) f32  -> logsumexp(x) - mean(x, 1)
    """
    x = x_ref[...].astype(jnp.float32)          # (TILE_N, C)
    t = t_ref[...]                              # (TILE_N, 1)
    tile_n, c = x.shape

    # Numerically stable logsumexp along classes (lane reduce -> XLU, exp/log -> EUP).
    m = jnp.max(x, axis=1, keepdims=True)
    ex = jnp.exp(x - m)
    lse = m + jnp.log(jnp.sum(ex, axis=1, keepdims=True))          # (TILE_N, 1)

    # Row mean of logits.
    row_mean = jnp.sum(x, axis=1, keepdims=True) * (1.0 / c)       # (TILE_N, 1)

    # Gather the target logit via a one-hot select (no dynamic lane gather on TPU).
    # NOTE: out-of-range / negative targets silently give x_target = 0
    # (loss term = lse) instead of raising like torch.nn.functional.cross_entropy.
    col = jax.lax.broadcasted_iota(jnp.int32, (tile_n, c), 1)
    x_target = jnp.sum(jnp.where(col == t, x, 0.0), axis=1, keepdims=True)

    # Mask rows past the true batch size: the last grid block is ragged (no
    # wrapper-side padding of x), so its out-of-bounds rows hold unspecified
    # data.  jnp.where keeps any NaN/Inf in those rows out of the reduction.
    n_valid = n_ref[0]
    row_ids = pl.program_id(0) * tile_n + jax.lax.broadcasted_iota(
        jnp.int32, (tile_n, 1), 0)
    valid = row_ids < n_valid

    err = jnp.where(valid, lse - x_target, 0.0)                    # masked CE
    # Per-tile partial sum of err -> (1, 1, 1). Padded rows contribute 0.
    err_sum_ref[...] = jnp.sum(err, axis=0, keepdims=True)[None]

    # Per-row uniformity error (garbage tail rows are sliced off in the glue).
    uni_ref[...] = lse - row_mean


def e3outlier_oe_loss(x, targets, lamb, size_average=True, tile_n=None):
    """JAX/Pallas equivalent of E3outlierOELoss.forward(x, targets).

    NOTE: `size_average` is accepted for API parity but is unused, exactly as
    in the reference PyTorch forward (cross_entropy(reduction='none') followed
    by err.mean()).
    """
    del size_average
    n, c = x.shape
    itemsize = jnp.dtype(x.dtype).itemsize
    if tile_n is None:
        tile_n = _choose_tile_n(n, c, itemsize)
    tile_n = max(8, _round_up(min(tile_n, _round_up(n, 8)), 8))
    num_tiles = -(-n // tile_n)                 # cdiv: ragged last block, no x pad
    n_pad = num_tiles * tile_n

    # Only the tiny int32 targets array is padded / reshaped (x stays as-is).
    t_p = jnp.pad(targets.astype(jnp.int32), (0, n_pad - n)).reshape(n_pad, 1)
    n_arr = jnp.array([n], dtype=jnp.int32)     # scalar prefetch -> SMEM

    cost = pl.CostEstimate(
        flops=7 * n * c,
        transcendentals=n * (c + 2),
        bytes_accessed=n * c * itemsize + n_pad * 4 + n_pad * 4 + num_tiles * 4,
    )

    grid_spec = pltpu.PrefetchScalarGridSpec(
        num_scalar_prefetch=1,
        grid=(num_tiles,),
        in_specs=[
            pl.BlockSpec((tile_n, c), lambda i, n_ref: (i, 0)),
            pl.BlockSpec((tile_n, 1), lambda i, n_ref: (i, 0)),
        ],
        out_specs=(
            pl.BlockSpec((1, 1, 1), lambda i, n_ref: (i, 0, 0)),
            pl.BlockSpec((tile_n, 1), lambda i, n_ref: (i, 0)),
        ),
    )

    err_part, uni = pl.pallas_call(
        _e3outlier_kernel,
        grid_spec=grid_spec,
        out_shape=(
            jax.ShapeDtypeStruct((num_tiles, 1, 1), jnp.float32),
            jax.ShapeDtypeStruct((n_pad, 1), jnp.float32),
        ),
        compiler_params=pltpu.CompilerParams(
            dimension_semantics=("parallel",),          # v7x megacore split
            vmem_limit_bytes=48 * 1024 * 1024,          # <= 48 MiB (v7x-safe)
        ),
        cost_estimate=cost,
    )(n_arr, x, t_p)

    err_mean = jnp.sum(err_part) / n

    # TODO(synk): sort / top-k has no clean in-kernel Pallas equivalent; the
    # tiny O(N) selection + scalar reduction is plain-JAX glue (top_k instead
    # of a full sort: only the spl smallest uni_err values are needed).
    uni_err = uni[:n, 0]
    spl = int(n * lamb)                         # matches torch's int(x.size(0) * lamb)
    if spl > 0:
        neg_small, _ = jax.lax.top_k(-uni_err, spl)     # spl smallest uni_err
        uni_term = -jnp.mean(neg_small)
    else:
        uni_term = jnp.float32(jnp.nan)         # matches torch: mean of empty slice
    return err_mean + lamb * uni_term


def _reference(x, targets, lamb):
    """Pure-JAX reference (mirrors the PyTorch forward exactly)."""
    x = x.astype(jnp.float32)
    lse = jax.scipy.special.logsumexp(x, axis=1)
    err = lse - x[jnp.arange(x.shape[0]), targets]
    uni_err = lse - jnp.mean(x, axis=1)
    uni_sorted = jnp.sort(uni_err)
    spl = int(x.shape[0] * lamb)
    return jnp.mean(err) + lamb * jnp.mean(uni_sorted[:spl])


if __name__ == "__main__":
    key = jax.random.PRNGKey(0)
    kx, kt = jax.random.split(key)

    N, C = 200, 16        # small batch, 16 "transformation" classes
    lamb = 0.25           # -> spl = int(200 * 0.25) = 50

    x = jax.random.normal(kx, (N, C), dtype=jnp.float32)
    targets = jax.random.randint(kt, (N,), 0, C, dtype=jnp.int32)

    ref = jax.block_until_ready(_reference(x, targets, lamb))

    # tile_n=128 -> 2-tile grid with a ragged last block (no x padding).
    loss = jax.block_until_ready(e3outlier_oe_loss(x, targets, lamb, tile_n=128))
    assert jnp.allclose(loss, ref, rtol=1e-5, atol=1e-5), (loss, ref)

    # Auto tile size (single tile covering the whole small batch).
    loss_auto = jax.block_until_ready(e3outlier_oe_loss(x, targets, lamb))
    assert jnp.allclose(loss_auto, ref, rtol=1e-5, atol=1e-5), (loss_auto, ref)

    print("KERNEL_OK")
</pallas_src>

<mosaic_0001>
module attributes {stable_mosaic.version = 11 : i64} {
  func.func @_e3outlier_kernel(%arg0: i32, %arg1: memref<1xi32, #tpu.memory_space<smem>>, %arg2: memref<128x16xf32, #tpu.memory_space<vmem>>, %arg3: memref<128x1xi32, #tpu.memory_space<vmem>>, %arg4: memref<1x1x1xf32, #tpu.memory_space<vmem>>, %arg5: memref<128x1xf32, #tpu.memory_space<vmem>>) attributes {dimension_semantics = [#tpu.dimension_semantics<parallel>], iteration_bounds = array<i64: 2>, scalar_prefetch = 1 : i64, scratch_operands = 0 : i64, tpu.core_type = #tpu.core_type<tc>, window_params = [{transform_indices = @transform_0, window_bounds = array<i64: 128, 16>}, {transform_indices = @transform_1, window_bounds = array<i64: 128, 1>}, {transform_indices = @transform_2, window_bounds = array<i64: 1, 1, 1>}, {transform_indices = @transform_3, window_bounds = array<i64: 128, 1>}]} {
    %c0 = arith.constant 0 : index
    %c0_0 = arith.constant 0 : index
    %0 = vector.load %arg2[%c0, %c0_0] : memref<128x16xf32, #tpu.memory_space<vmem>>, vector<128x16xf32>
    %c0_1 = arith.constant 0 : index
    %c0_2 = arith.constant 0 : index
    %1 = vector.load %arg3[%c0_1, %c0_2] : memref<128x1xi32, #tpu.memory_space<vmem>>, vector<128x1xi32>
    %cst = arith.constant dense<0xFF800000> : vector<128xf32>
    %2 = vector.multi_reduction <maximumf>, %0, %cst [1] : vector<128x16xf32> to vector<128xf32>
    %3 = vector.shape_cast %2 : vector<128xf32> to vector<128x1xf32>
    %4 = vector.broadcast %3 : vector<128x1xf32> to vector<128x16xf32>
    %5 = arith.subf %0, %4 : vector<128x16xf32>
    %6 = math.exp %5 : vector<128x16xf32>
    %cst_3 = arith.constant dense<0.000000e+00> : vector<128xf32>
    %7 = vector.multi_reduction <add>, %6, %cst_3 [1] : vector<128x16xf32> to vector<128xf32>
    %8 = vector.shape_cast %7 : vector<128xf32> to vector<128x1xf32>
    %9 = math.log %8 : vector<128x1xf32>
    %10 = arith.addf %3, %9 : vector<128x1xf32>
    %cst_4 = arith.constant dense<0.000000e+00> : vector<128xf32>
    %11 = vector.multi_reduction <add>, %0, %cst_4 [1] : vector<128x16xf32> to vector<128xf32>
    %12 = vector.shape_cast %11 : vector<128xf32> to vector<128x1xf32>
    %cst_5 = arith.constant 6.250000e-02 : f32
    %13 = vector.broadcast %cst_5 : f32 to vector<128x1xf32>
    %14 = arith.mulf %12, %13 : vector<128x1xf32>
    %15 = tpu.iota {dimensions = array<i32: 1>} : vector<128x16xi32>
    %16 = vector.broadcast %1 : vector<128x1xi32> to vector<128x16xi32>
    %17 = arith.cmpi eq, %15, %16 : vector<128x16xi32>
    %cst_6 = arith.constant 0.000000e+00 : f32
    %18 = vector.broadcast %cst_6 : f32 to vector<128x16xf32>
    %19 = arith.select %17, %0, %18 : vector<128x16xi1>, vector<128x16xf32>
    %cst_7 = arith.constant dense<0.000000e+00> : vector<128xf32>
    %20 = vector.multi_reduction <add>, %19, %cst_7 [1] : vector<128x16xf32> to vector<128xf32>
    %21 = vector.shape_cast %20 : vector<128xf32> to vector<128x1xf32>
    %c0_8 = arith.constant 0 : index
    %22 = memref.load %arg1[%c0_8] : memref<1xi32, #tpu.memory_space<smem>>
    %c128_i32 = arith.constant 128 : i32
    %23 = arith.muli %arg0, %c128_i32 : i32
    %24 = tpu.iota {dimensions = array<i32: 0>} : vector<128x1xi32>
    %25 = vector.broadcast %23 : i32 to vector<128x1xi32>
    %26 = arith.addi %25, %24 : vector<128x1xi32>
    %27 = vector.broadcast %22 : i32 to vector<128x1xi32>
    %28 = arith.cmpi slt, %26, %27 : vector<128x1xi32>
    %29 = arith.subf %10, %21 : vector<128x1xf32>
    %cst_9 = arith.constant 0.000000e+00 : f32
    %30 = vector.broadcast %cst_9 : f32 to vector<128x1xf32>
    %31 = arith.select %28, %29, %30 : vector<128x1xi1>, vector<128x1xf32>
    %cst_10 = arith.constant dense<0.000000e+00> : vector<1xf32>
    %32 = vector.multi_reduction <add>, %31, %cst_10 [0] : vector<128x1xf32> to vector<1xf32>
    %33 = vector.shape_cast %32 : vector<1xf32> to vector<1x1xf32>
    %34 = vector.shape_cast %33 : vector<1x1xf32> to vector<1x1x1xf32>
    %c0_11 = arith.constant 0 : index
    %c0_12 = arith.constant 0 : index
    %c0_13 = arith.constant 0 : index
    %35 = vector.load %arg4[%c0_11, %c0_12, %c0_13] : memref<1x1x1xf32, #tpu.memory_space<vmem>>, vector<1x1x1xf32>
    tpu.vector_store %arg4[%c0_11, %c0_12, %c0_13], %34 {strides = array<i32>} : memref<1x1x1xf32, #tpu.memory_space<vmem>>, vector<1x1x1xf32>,
    %36 = arith.subf %10, %14 : vector<128x1xf32>
    %c0_14 = arith.constant 0 : index
    %c0_15 = arith.constant 0 : index
    %37 = vector.load %arg5[%c0_14, %c0_15] : memref<128x1xf32, #tpu.memory_space<vmem>>, vector<128x1xf32>
    tpu.vector_store %arg5[%c0_14, %c0_15], %36 {strides = array<i32>} : memref<128x1xf32, #tpu.memory_space<vmem>>, vector<128x1xf32>,
    return
  }
  func.func @transform_0(%arg0: i32, %arg1: memref<1xi32, #tpu.memory_space<smem>>) -> (i32, i32) {
    %c0_i32 = arith.constant 0 : i32
    %c0_i32_0 = arith.constant 0 : i32
    return %arg0, %c0_i32 : i32, i32
  }
  func.func @transform_1(%arg0: i32, %arg1: memref<1xi32, #tpu.memory_space<smem>>) -> (i32, i32) {
    %c0_i32 = arith.constant 0 : i32
    %c0_i32_0 = arith.constant 0 : i32
    return %arg0, %c0_i32 : i32, i32
  }
  func.func @transform_2(%arg0: i32, %arg1: memref<1xi32, #tpu.memory_space<smem>>) -> (i32, i32, i32) {
    %c0_i32 = arith.constant 0 : i32
    %c0_i32_0 = arith.constant 0 : i32
    %c0_i32_1 = arith.constant 0 : i32
    return %arg0, %c0_i32, %c0_i32_0 : i32, i32, i32
  }
  func.func @transform_3(%arg0: i32, %arg1: memref<1xi32, #tpu.memory_space<smem>>) -> (i32, i32) {
    %c0_i32 = arith.constant 0 : i32
    %c0_i32_0 = arith.constant 0 : i32
    return %arg0, %c0_i32 : i32, i32
  }
}

</mosaic_0001>

<bundles_post_ra>
// kernel: tpu_custom_call.1
= control target key start
LH: loop header
LB: loop body
LE: loop exit
PB: predicated region body
PF: predicated region fallthrough
CT: control target
= control target key end

     0   :  { %s1006_s17 = smov 0   ;;  %s1573_s0 = inlined_call_operand.<no memory space> [shape: s32[1], index: 0, kind: input, shape index: {}]   ;;  %s1574_s1 = inlined_call_operand.vmem [shape: f32[200,16], index: 1, kind: input, shape index: {}]   ;;  %s1575_s2 = inlined_call_operand.vmem [shape: s32[256,1], index: 2, kind: input, shape index: {}]   ;;  %s1576_s3 = inlined_call_operand.vmem [shape: f32[2,1,1], index: 3, kind: output, shape index: {0}]   ;;  %s1577_s4 = inlined_call_operand.vmem [shape: f32[256,1], index: 4, kind: output, shape index: {1}]  }
   0x1   :  { %10 = sst [smem:[#allocation3]] %s1573_s0 }
   0x2 LB: > { %s1012_s18 = sadd.s32 4294967295, %s975_s17   ;;  %p884_p0 = scmp.ge.s32.totalorder %s975_s17, 1  ;;  %s975_s17 = sphi %s1006_s17, %s16_s17  }
   0x3   : > { %p162_p1 = scmp.lt.s32.totalorder %s975_s17, 3 }
   0x5   : > { %p163_p2 = pnand %p884_p0, %p162_p1 }
   0x6   : > { %s1017_s19 = sshll.u32 (!%p163_p2), %s1012_s18, 4  ;;  %v977_v0 = vmov (!%p163_p2), 0   ;;  %vm259_vm0 = vcmask (!%p163_p2), 130048   ;;  %v516_v63 = vlaneseq (!%p163_p2)  ;;  %s646_s28 = sld [smem:[#allocation3]] (!%p163_p2) }
   0x7   : > { %166 = sbr.rel (%p163_p2) target bundleno = 440 (0x1b8), region = 28  ;;  %p203_p3 = scmp.lt.s32.totalorder (!%p163_p2), %s1017_s19, 24  ;;  %904 = vset.pattern.permute.xlu1 (!%p163_p2), %v977_v0  ;;  %903 = vset.pattern.permute.xlu0 (!%p163_p2), %v977_v0 }
   0x8   : > { %p213_p4 = scmp.lt.s32.totalorder (!%p163_p2), %s1017_s19, 31  ;;  %s891_s29 = sshll.u32 (!%p163_p2), %s1012_s18, 7 }
   0x9   : > { %p218_p5 = scmp.lt.s32.totalorder (!%p163_p2), %s1012_s18, 1 }
   0xe   : > { %s204_s0 = scalar_select %p203_p3, %s1017_s19, 24 }
   0xf   : > { %s1579_s19 = smov (!%p213_p4, %s1017_s19), 31  ;;  %s1581_s18 = smov (!%p218_p5, %s1012_s18), 1 }
  0x10   : > { %s886_s20 = sshll.u32 %s204_s0, 3  ;;  %s888_s24 = sshll.u32 %s1579_s19, 3 }
  0x11   : > { %s1024_s23 = scalar_lea.vmem %s1574_s1, %s886_s20  ;;  %s1116_s27 = scalar_lea.vmem %s1575_s2, %s888_s24 }
  0x12   : > { %v1027_v1 = vld [vmem:[%s1024_s23 + $0x10] sm:$0xff]  ;;  %v1030_v2 = vld [vmem:[%s1024_s23] sm:$0xff]  ;;  %v1033_v3 = vld [vmem:[%s1024_s23 + $0x18] sm:$0xff]  ;;  %s1467_s6 = scalar_lea.vmem %s1577_s4, %s888_s24  ;;  %s220_s9 = scalar_lea.vmem %s1576_s3, %s1581_s18 }
  0x13   : > { %v266_v4 = vsel %vm259_vm0, %v1027_v1, -inf  ;;  %v260_v5 = vsel %vm259_vm0, %v1030_v2, -inf  ;;  %v1040_v6 = vld [vmem:[%s1024_s23 + $0x8] sm:$0xff]  ;;  %v269_v7 = vsel %vm259_vm0, %v1033_v3, -inf  ;;  %v1050_v10 = vld [vmem:[%s1024_s23 + $0x20] sm:$0xff]  ;;  %v1057_v13 = vld [vmem:[%s1024_s23 + $0x38] sm:$0xff] }
  0x14   : > { %267 = vmax.xlane.f32.xlu1 %v266_v4  ;;  %261 = vmax.xlane.f32.xlu0 %v260_v5  ;;  %v263_v8 = vsel %vm259_vm0, %v1040_v6, -inf  ;;  %v1047_v9 = vld [vmem:[%s1024_s23 + $0x28] sm:$0xff]  ;;  %v272_v12 = vsel %vm259_vm0, %v1050_v10, -inf  ;;  %v1060_v14 = vld [vmem:[%s1024_s23 + $0x30] sm:$0xff]  ;;  %v281_v15 = vsel %vm259_vm0, %v1057_v13, -inf  ;;  %v1070_v18 = vld [vmem:[%s1024_s23 + $0x40] sm:$0xff] }
  0x15   : > { %v275_v11 = vsel %vm259_vm0, %v1047_v9, -inf  ;;  %v278_v16 = vsel %vm259_vm0, %v1060_v14, -inf  ;;  %v1067_v17 = vld [vmem:[%s1024_s23 + $0x48] sm:$0xff]  ;;  %v284_v20 = vsel %vm259_vm0, %v1070_v18, -inf  ;;  %v1077_v21 = vld [vmem:[%s1024_s23 + $0x58] sm:$0xff]  ;;  %v1080_v22 = vld [vmem:[%s1024_s23 + $0x50] sm:$0xff] }
  0x16   : > { %v287_v19 = vsel %vm259_vm0, %v1067_v17, -inf  ;;  %v293_v23 = vsel %vm259_vm0, %v1077_v21, -inf  ;;  %v290_v24 = vsel %vm259_vm0, %v1080_v22, -inf  ;;  %v1087_v25 = vld [vmem:[%s1024_s23 + $0x68] sm:$0xff]  ;;  %v1090_v26 = vld [vmem:[%s1024_s23 + $0x60] sm:$0xff]  ;;  %v1097_v29 = vld [vmem:[%s1024_s23 + $0x78] sm:$0xff] }
  0x17   : > { %v299_v27 = vsel %vm259_vm0, %v1087_v25, -inf  ;;  %v296_v28 = vsel %vm259_vm0, %v1090_v26, -inf  ;;  %v1100_v30 = vld [vmem:[%s1024_s23 + $0x70] sm:$0xff]  ;;  %v305_v31 = vsel %vm259_vm0, %v1097_v29, -inf  ;;  %v244_v33 = vld [vmem:[%s1116_s27 + $0x8] sm:$0xff]  ;;  %v243_v35 = vld [vmem:[%s1116_s27] sm:$0xff] }
  0x18   : > { %270 = vmax.xlane.f32.xlu1 %v269_v7  ;;  %264 = vmax.xlane.f32.xlu0 %v263_v8  ;;  %v302_v32 = vsel %vm259_vm0, %v1100_v30, -inf  ;;  %v245_v34 = vld [vmem:[%s1116_s27 + $0x10] sm:$0xff]  ;;  %v246_v36 = vld [vmem:[%s1116_s27 + $0x18] sm:$0xff]  ;;  %v252_v37 = vld [vmem:[%s1116_s27 + $0x48] sm:$0xff] }
  0x19   : > { %v247_v38 = vld [vmem:[%s1116_s27 + $0x20] sm:$0xff]  ;;  %v254_v39 = vld [vmem:[%s1116_s27 + $0x58] sm:$0xff]  ;;  %v248_v40 = vld [vmem:[%s1116_s27 + $0x28] sm:$0xff] }
  0x1a   : > { %v256_v41 = vld [vmem:[%s1116_s27 + $0x68] sm:$0xff]  ;;  %v249_v42 = vld [vmem:[%s1116_s27 + $0x30] sm:$0xff]  ;;  %v258_v43 = vld [vmem:[%s1116_s27 + $0x78] sm:$0xff] }
  0x1b   : > { %v250_v44 = vld [vmem:[%s1116_s27 + $0x38] sm:$0xff]  ;;  %v251_v45 = vld [vmem:[%s1116_s27 + $0x40] sm:$0xff]  ;;  %v253_v46 = vld [vmem:[%s1116_s27 + $0x50] sm:$0xff] }
  0x1c   : > { %276 = vmax.xlane.f32.xlu1 %v275_v11  ;;  %273 = vmax.xlane.f32.xlu0 %v272_v12  ;;  %v255_v47 = vld [vmem:[%s1116_s27 + $0x60] sm:$0xff]  ;;  %v257_v48 = vld [vmem:[%s1116_s27 + $0x70] sm:$0xff]  ;;  %v1171_v11 = vand.u32 127, %v516_v63 }
  0x20   : > { %282 = vmax.xlane.f32.xlu1 %v281_v15  ;;  %279 = vmax.xlane.f32.xlu0 %v278_v16 }
  0x24   : > { %288 = vmax.xlane.f32.xlu1 %v287_v19  ;;  %285 = vmax.xlane.f32.xlu0 %v284_v20 }
  0x28   : > { %294 = vmax.xlane.f32.xlu1 %v293_v23  ;;  %291 = vmax.xlane.f32.xlu0 %v290_v24 }
  0x2c   : > { %300 = vmax.xlane.f32.xlu1 %v299_v27  ;;  %297 = vmax.xlane.f32.xlu0 %v296_v28 }
  0x30   : > { %306 = vmax.xlane.f32.xlu1 %v305_v31  ;;  %303 = vmax.xlane.f32.xlu0 %v302_v32 }
  0x41   : > { %522 = vperm.xlu1 %904, %v244_v33  }
  0x45   : > { %525 = vperm.xlu1 %904, %v245_v34  }
  0x46   : > { %519 = vperm.xlu0 %903, %v243_v35  }
  0x49   : > { %528 = vperm.xlu1 %904, %v246_v36  }
  0x4a   : > { %546 = vperm.xlu0 %903, %v252_v37  }
  0x4d   : > { %531 = vperm.xlu1 %904, %v247_v38  }
  0x4e   : > { %552 = vperm.xlu0 %903, %v254_v39  }
  0x51   : > { %534 = vperm.xlu1 %904, %v248_v40  }
  0x52   : > { %558 = vperm.xlu0 %903, %v256_v41  }
  0x55   : > { %537 = vperm.xlu1 %904, %v249_v42  }
  0x56   : > { %564 = vperm.xlu0 %903, %v258_v43  }
  0x59   : > { %540 = vperm.xlu1 %904, %v250_v44  }
  0x5d   : > { %543 = vperm.xlu1 %904, %v251_v45  }
  0x61   : > { %549 = vperm.xlu1 %904, %v253_v46  }
  0x65   : > { %555 = vperm.xlu1 %904, %v255_v47  }
  0x69   : > { %561 = vperm.xlu1 %904, %v257_v48  }
  0xa1   : > { %v1134_v49 = vpop.xlane.xlu1 %267  ;;  %v1136_v50 = vpop.xlane.xlu0 %261 }
  0xa2   : > { %v308_v46 = vsub.f32 %v1030_v2, %v1136_v50 }
  0xa5   : > { %v1138_v51 = vpop.xlane.xlu1 %270  ;;  %v1140_v52 = vpop.xlane.xlu0 %264 }
  0xa6   : > { %v309_v61 = vsub.f32 %v1040_v6, %v1140_v52  ;;  %v311_v0 = vsub.f32 %v1033_v3, %v1138_v51 }
  0xa8   : > { %v326_v4 = vmul.f32 1.442695, %v309_v61  ;;  %v330_v12 = vmul.f32 1.442695, %v311_v0 }
  0xa9   : > { %v1142_v53 = vpop.xlane.xlu1 %276  ;;  %v1144_v54 = vpop.xlane.xlu0 %273 }
  0xaa   : > { %v312_v8 = vsub.f32 %v1050_v10, %v1144_v54  ;;  %905 = vpow2.f32 %v326_v4 }
  0xab   : > { %907 = vpow2.f32 %v330_v12 }
  0xac   : > { %v332_v19 = vmul.f32 1.442695, %v312_v8 }
  0xad   : > { %v1146_v55 = vpop.xlane.xlu1 %282  ;;  %v1148_v56 = vpop.xlane.xlu0 %279 }
  0xae   : > { %v315_v20 = vsub.f32 %v1057_v13, %v1146_v55  ;;  %909 = vpow2.f32 %v332_v19  ;;  %v324_v19 = vmul.f32 1.442695, %v308_v46 }
  0xb0   : > { %v338_v31 = vmul.f32 1.442695, %v315_v20 }
  0xb1   : > { %v1150_v57 = vpop.xlane.xlu1 %288  ;;  %v1152_v58 = vpop.xlane.xlu0 %285 }
  0xb2   : > { %v317_v32 = vsub.f32 %v1067_v17, %v1150_v57  ;;  %911 = vpow2.f32 %v338_v31 }
  0xb4   : > { %v906_v37 = vpop.eup %905  ;;  %v342_v39 = vmul.f32 1.442695, %v317_v32 }
  0xb5   : > { %v1154_v59 = vpop.xlane.xlu1 %294  ;;  %v1156_v60 = vpop.xlane.xlu0 %291  ;;  %v359_v43 = vsel %vm259_vm0, %v906_v37, 0.0 }
  0xb6   : > { %v318_v40 = vsub.f32 %v1080_v22, %v1156_v60  ;;  %v908_v44 = vpop.eup %907  ;;  %913 = vpow2.f32 %v342_v39  ;;  %v319_v47 = vsub.f32 %v1077_v21, %v1154_v59 }
  0xb7   : > { %v365_v8 = vsel %vm259_vm0, %v908_v44, 0.0 }
  0xb8   : > { %v344_v48 = vmul.f32 1.442695, %v318_v40  ;;  %v910_v0 = vpop.eup %909  ;;  %v346_v20 = vmul.f32 1.442695, %v319_v47 }
  0xb9   : > { %v1160_v62 = vpop.xlane.xlu1 %300  ;;  %v1164_v5 = vpop.xlane.xlu0 %297 }
  0xba   : > { %915 = vpow2.f32 %v344_v48 }
  0xbb   : > { %917 = vpow2.f32 %v324_v19 }
  0xbc   : > { %v912_v31 = vpop.eup %911  ;;  %919 = vpow2.f32 %v346_v20 }
  0xbd   : > { %v1166_v7 = vpop.xlane.xlu1 %306  ;;  %v1173_v15 = vpop.xlane.xlu0 %303  ;;  %v377_v39 = vsel %vm259_vm0, %v912_v31, 0.0 }
  0xc0   : > { %v914_v40 = vpop.eup %913 }
  0xc1   : > { %v523_v16 = vpop.permute.xlu1 %522  ;;  %v383_v48 = vsel %vm259_vm0, %v914_v40, 0.0 }
  0xc2   : > { %vm567_vm1 = vcmp.eq.s32.totalorder %v1171_v11, %v523_v16  ;;  %v310_v16 = vsub.f32 %v1027_v1, %v1134_v49 }
  0xc3   : > { %v583_v23 = vsel %vm567_vm1, %v1040_v6, 0.0 }
  0xc4   : > { %v601_v24 = vsel %vm259_vm0, %v583_v23, 0.0  ;;  %v320_v23 = vsub.f32 %v1090_v26, %v1164_v5 }
  0xc5   : > { %v526_v27 = vpop.permute.xlu1 %525  ;;  %602 = vadd.xlane.f32.xlu0 %v601_v24  ;;  %v520_v28 = vpop.permute.xlu0 %519 }
  0xc6   : > { %vm568_vm2 = vcmp.eq.s32.totalorder %v1171_v11, %v526_v27  ;;  %vm566_vm3 = vcmp.eq.s32.totalorder %v1171_v11, %v520_v28  ;;  %v368_v28 = vsel %vm259_vm0, %v910_v0, 0.0 }
  0xc7   : > { %v584_v33 = vsel %vm568_vm2, %v1027_v1, 0.0  ;;  %v582_v34 = vsel %vm566_vm3, %v1030_v2, 0.0 }
  0xc8   : > { %v604_v35 = vsel %vm259_vm0, %v584_v33, 0.0  ;;  %v598_v36 = vsel %vm259_vm0, %v582_v34, 0.0  ;;  %v328_v33 = vmul.f32 1.442695, %v310_v16  ;;  %v313_v34 = vsub.f32 %v1047_v9, %v1142_v53 }
  0xc9   : > { %v529_v38 = vpop.permute.xlu1 %528  ;;  %605 = vadd.xlane.f32.xlu0 %v604_v35  ;;  %599 = vadd.xlane.f32.xlu1 %v598_v36  ;;  %v321_v35 = vsub.f32 %v1087_v25, %v1160_v62  ;;  %v348_v36 = vmul.f32 1.442695, %v320_v23  ;;  %v547_v40 = vpop.permute.xlu0 %546 }
  0xca   : > { %vm569_vm4 = vcmp.eq.s32.totalorder %v1171_v11, %v529_v38  ;;  %921 = vpow2.f32 %v328_v33  ;;  %vm575_vm10 = vcmp.eq.s32.totalorder %v1171_v11, %v547_v40  ;;  %v452_v40 = vsel %vm259_vm0, %v1030_v2, 0.0 }
  0xcb   : > { %v585_v41 = vsel %vm569_vm4, %v1033_v3, 0.0  ;;  %v350_v44 = vmul.f32 1.442695, %v321_v35  ;;  %923 = vpow2.f32 %v348_v36  ;;  %v470_v2 = vsel %vm259_vm0, %v1060_v14, 0.0 }
  0xcc   : > { %v607_v42 = vsel %vm259_vm0, %v585_v41, 0.0 }
  0xcd   : > { %v532_v45 = vpop.permute.xlu1 %531  ;;  %608 = vadd.xlane.f32.xlu0 %v607_v42  ;;  %360 = vadd.xlane.f32.xlu1 %v359_v43  ;;  %v334_v42 = vmul.f32 1.442695, %v313_v34  ;;  %v314_v43 = vsub.f32 %v1060_v14, %v1148_v56 }
  0xce   : > { %vm570_vm5 = vcmp.eq.s32.totalorder %v1171_v11, %v532_v45  ;;  %v322_v45 = vsub.f32 %v1100_v30, %v1173_v15 }
  0xcf   : > { %v586_v61 = vsel %vm570_vm5, %v1050_v10, 0.0  ;;  %925 = vpow2.f32 %v334_v42 }
  0xd0   : > { %v610_v4 = vsel %vm259_vm0, %v586_v61, 0.0  ;;  %v916_v61 = vpop.eup %915  ;;  %927 = vpow2.f32 %v350_v44  ;;  %v352_v16 = vmul.f32 1.442695, %v322_v45 }
  0xd1   : > { %v535_v12 = vpop.permute.xlu1 %534  ;;  %611 = vadd.xlane.f32.xlu0 %v610_v4  ;;  %366 = vadd.xlane.f32.xlu1 %v365_v8  ;;  %v336_v4 = vmul.f32 1.442695, %v314_v43  ;;  %v316_v8 = vsub.f32 %v1070_v18, %v1152_v58  ;;  %v918_v20 = vpop.eup %917 }
  0xd2   : > { %vm571_vm6 = vcmp.eq.s32.totalorder %v1171_v11, %v535_v12  ;;  %v323_v12 = vsub.f32 %v1097_v29, %v1166_v7  ;;  %v356_v33 = vsel %vm259_vm0, %v918_v20, 0.0  ;;  %v591_v20 = vsel %vm575_vm10, %v1067_v17, 0.0 }
  0xd3   : > { %v587_v24 = vsel %vm571_vm6, %v1047_v9, 0.0  ;;  %929 = vpow2.f32 %v336_v4 }
  0xd4   : > { %v613_v27 = vsel %vm259_vm0, %v587_v24, 0.0  ;;  %v386_v24 = vsel %vm259_vm0, %v916_v61, 0.0  ;;  %v354_v31 = vmul.f32 1.442695, %v323_v12  ;;  %931 = vpow2.f32 %v352_v16 }
  0xd5   : > { %v538_v32 = vpop.permute.xlu1 %537  ;;  %614 = vadd.xlane.f32.xlu0 %v613_v27  ;;  %369 = vadd.xlane.f32.xlu1 %v368_v28  ;;  %v920_v27 = vpop.eup %919  ;;  %v340_v28 = vmul.f32 1.442695, %v316_v8 }
  0xd6   : > { %vm572_vm7 = vcmp.eq.s32.totalorder %v1171_v11, %v538_v32  ;;  %v922_v32 = vpop.eup %921  ;;  %v389_v34 = vsel %vm259_vm0, %v920_v27, 0.0  ;;  %v625_v27 = vsel %vm259_vm0, %v591_v20, 0.0 }
  0xd7   : > { %v588_v37 = vsel %vm572_vm7, %v1060_v14, 0.0  ;;  %v924_v35 = vpop.eup %923  ;;  %933 = vpow2.f32 %v340_v28  ;;  %v485_v14 = vsel %vm259_vm0, %v1077_v21, 0.0 }
  0xd8   : > { %v616_v38 = vsel %vm259_vm0, %v588_v37, 0.0  ;;  %935 = vpow2.f32 %v354_v31  ;;  %v362_v37 = vsel %vm259_vm0, %v922_v32, 0.0 }
  0xd9   : > { %v541_v41 = vpop.permute.xlu1 %540  ;;  %617 = vadd.xlane.f32.xlu0 %v616_v38  ;;  %378 = vadd.xlane.f32.xlu1 %v377_v39  ;;  %v926_v36 = vpop.eup %925  ;;  %v392_v38 = vsel %vm259_vm0, %v924_v35, 0.0 }
  0xda   : > { %vm573_vm8 = vcmp.eq.s32.totalorder %v1171_v11, %v541_v41  ;;  %v928_v39 = vpop.eup %927  ;;  %v371_v43 = vsel %vm259_vm0, %v926_v36, 0.0 }
  0xdb   : > { %v589_v46 = vsel %vm573_vm8, %v1057_v13, 0.0  ;;  %v395_v44 = vsel %vm259_vm0, %v928_v39, 0.0 }
  0xdc   : > { %v619_v47 = vsel %vm259_vm0, %v589_v46, 0.0  ;;  %v553_v46 = vpop.permute.xlu0 %552 }
  0xdd   : > { %v544_v0 = vpop.permute.xlu1 %543  ;;  %620 = vadd.xlane.f32.xlu0 %v619_v47  ;;  %384 = vadd.xlane.f32.xlu1 %v383_v48  ;;  %v930_v42 = vpop.eup %929  ;;  %vm577_vm12 = vcmp.eq.s32.totalorder %v1171_v11, %v553_v46 }
  0xde   : > { %vm574_vm9 = vcmp.eq.s32.totalorder %v1171_v11, %v544_v0  ;;  %v932_v45 = vpop.eup %931  ;;  %v374_v48 = vsel %vm259_vm0, %v930_v42, 0.0  ;;  %v593_v31 = vsel %vm577_vm12, %v1077_v21, 0.0  ;;  %v458_v42 = vsel %vm259_vm0, %v1027_v1, 0.0 }
  0xdf   : > { %v590_v19 = vsel %vm574_vm9, %v1070_v18, 0.0  ;;  %v398_v61 = vsel %vm259_vm0, %v932_v45, 0.0  ;;  %v467_v45 = vsel %vm259_vm0, %v1047_v9, 0.0  ;;  %v476_v1 = vsel %vm259_vm0, %v1070_v18, 0.0 }
  0xe0   : > { %v622_v23 = vsel %vm259_vm0, %v590_v19, 0.0  ;;  %v559_v16 = vpop.permute.xlu0 %558  ;;  %v488_v9 = vsel %vm259_vm0, %v1090_v26, 0.0  ;;  %v491_v18 = vsel %vm259_vm0, %v1087_v25, 0.0 }
  0xe1   : > { %623 = vadd.xlane.f32.xlu0 %v622_v23  ;;  %387 = vadd.xlane.f32.xlu1 %v386_v24  ;;  %v550_v41 = vpop.permute.xlu1 %549  ;;  %v934_v47 = vpop.eup %933  ;;  %vm579_vm14 = vcmp.eq.s32.totalorder %v1171_v11, %v559_v16 }
  0xe2   : > { %v936_v0 = vpop.eup %935  ;;  %vm576_vm11 = vcmp.eq.s32.totalorder %v1171_v11, %v550_v41  ;;  %v380_v8 = vsel %vm259_vm0, %v934_v47, 0.0  ;;  %v595_v36 = vsel %vm579_vm14, %v1087_v25, 0.0 }
  0xe3   : > { %v401_v12 = vsel %vm259_vm0, %v936_v0, 0.0  ;;  %v592_v19 = vsel %vm576_vm11, %v1080_v22, 0.0 }
  0xe4   : > { %v628_v24 = vsel %vm259_vm0, %v592_v19, 0.0  ;;  %v565_v32 = vpop.permute.xlu0 %564 }
  0xe5   : > { %357 = vadd.xlane.f32.xlu0 %v356_v33  ;;  %390 = vadd.xlane.f32.xlu1 %v389_v34  ;;  %v556_v4 = vpop.permute.xlu1 %555  ;;  %v631_v34 = vsel %vm259_vm0, %v593_v31, 0.0  ;;  %vm581_vm1 = vcmp.eq.s32.totalorder %v1171_v11, %v565_v32  ;;  %v1320_v32 = vstv %s891_s29 }
  0xe6   : > { %vm578_vm13 = vcmp.eq.s32.totalorder %v1171_v11, %v556_v4  ;;  %v597_v39 = vsel %vm581_vm1, %v1097_v29, 0.0 }
  0xe7   : > { %v594_v28 = vsel %vm578_vm13, %v1090_v26, 0.0  ;;  %v643_v41 = vsel %vm259_vm0, %v597_v39, 0.0  ;;  %vm770_vm13 = vcmask 7168  }
  0xe8   : > { %v634_v33 = vsel %vm259_vm0, %v594_v28, 0.0 }
  0xe9   : > { %363 = vadd.xlane.f32.xlu0 %v362_v37  ;;  %393 = vadd.xlane.f32.xlu1 %v392_v38  ;;  %v562_v23 = vpop.permute.xlu1 %561  ;;  %v637_v38 = vsel %vm259_vm0, %v595_v36, 0.0 }
  0xea   : > { %vm580_vm15 = vcmp.eq.s32.totalorder %v1171_v11, %v562_v23  ;;  %v455_v11 = vsel %vm259_vm0, %v1040_v6, 0.0  ;;  %v473_v6 = vsel %vm259_vm0, %v1057_v13, 0.0  ;;  %v494_v13 = vsel %vm259_vm0, %v1100_v30, 0.0 }
  0xeb   : > { %v596_v35 = vsel %vm580_vm15, %v1100_v30, 0.0  ;;  %v1316_v23 = vshrl.u32 %v516_v63, 7 }
  0xec   : > { %v640_v37 = vsel %vm259_vm0, %v596_v35, 0.0 }
  0xed   : > { %372 = vadd.xlane.f32.xlu0 %v371_v43  ;;  %396 = vadd.xlane.f32.xlu1 %v395_v44  ;;  %v464_v43 = vsel %vm259_vm0, %v1050_v10, 0.0  ;;  %v461_v44 = vsel %vm259_vm0, %v1033_v3, 0.0  ;;  %v482_v3 = vsel %vm259_vm0, %v1080_v22, 0.0  ;;  %v479_v10 = vsel %vm259_vm0, %v1067_v17, 0.0 }
  0xee   : > { %v497_v17 = vsel %vm259_vm0, %v1097_v29, 0.0  ;;  %v650_v31 = vadd.s32 8, %v1316_v23 }
  0xf1   : > { %375 = vadd.xlane.f32.xlu0 %v374_v48  ;;  %399 = vadd.xlane.f32.xlu1 %v398_v61 }
  0xf5   : > { %381 = vadd.xlane.f32.xlu0 %v380_v8  ;;  %402 = vadd.xlane.f32.xlu1 %v401_v12 }
  0xf9   : > { %629 = vadd.xlane.f32.xlu0 %v628_v24  ;;  %626 = vadd.xlane.f32.xlu1 %v625_v27 }
  0xfd   : > { %635 = vadd.xlane.f32.xlu0 %v634_v33  ;;  %632 = vadd.xlane.f32.xlu1 %v631_v34  ;;  %v652_v33 = vadd.s32 24, %v1316_v23  ;;  %v653_v34 = vadd.s32 32, %v1316_v23 }
 0x101   : > { %641 = vadd.xlane.f32.xlu0 %v640_v37  ;;  %638 = vadd.xlane.f32.xlu1 %v637_v38  ;;  %v667_v38 = vadd.s32 %v1320_v32, %v650_v31 }
 0x105   : > { %453 = vadd.xlane.f32.xlu0 %v452_v40  ;;  %644 = vadd.xlane.f32.xlu1 %v643_v41  ;;  %v1325_v40 = vstv %s646_s28  ;;  %v1328_v41 = vadd.s32 %v1320_v32, %v652_v33 }
 0x106   : > { %vm684_vm0 = vcmp.lt.s32.totalorder %v667_v38, %v1325_v40 }
 0x107   : > { %vm686_vm2 = vcmp.lt.s32.totalorder %v1328_v41, %v1325_v40 }
 0x109   : > { %459 = vadd.xlane.f32.xlu0 %v458_v42  ;;  %456 = vadd.xlane.f32.xlu1 %v455_v11  ;;  %v1331_v42 = vadd.s32 %v1320_v32, %v653_v34 }
 0x10b   : > { %vm687_vm3 = vcmp.lt.s32.totalorder %v1331_v42, %v1325_v40 }
 0x10d   : > { %465 = vadd.xlane.f32.xlu0 %v464_v43  ;;  %462 = vadd.xlane.f32.xlu1 %v461_v44 }
 0x111   : > { %471 = vadd.xlane.f32.xlu0 %v470_v2  ;;  %468 = vadd.xlane.f32.xlu1 %v467_v45  ;;  %v666_v2 = vadd.s32 %v1320_v32, %v1316_v23  ;;  %v651_v45 = vadd.s32 16, %v1316_v23 }
 0x113   : > { %vm683_vm4 = vcmp.lt.s32.totalorder %v666_v2, %v1325_v40 }
 0x115   : > { %477 = vadd.xlane.f32.xlu0 %v476_v1  ;;  %474 = vadd.xlane.f32.xlu1 %v473_v6 }
 0x119   : > { %483 = vadd.xlane.f32.xlu0 %v482_v3  ;;  %480 = vadd.xlane.f32.xlu1 %v479_v10  ;;  %v656_v3 = vadd.s32 56, %v1316_v23 }
 0x11d   : > { %489 = vadd.xlane.f32.xlu0 %v488_v9  ;;  %486 = vadd.xlane.f32.xlu1 %v485_v14  ;;  %v658_v9 = vadd.s32 72, %v1316_v23 }
 0x121   : > { %495 = vadd.xlane.f32.xlu0 %v494_v13  ;;  %492 = vadd.xlane.f32.xlu1 %v491_v18 }
 0x125   : > { %498 = vadd.xlane.f32.xlu1 %v497_v17 }
 0x152   : > { %v1297_v22 = vpop.xlane.xlu0 %602 }
 0x156   : > { %v1299_v26 = vpop.xlane.xlu1 %599  ;;  %v1301_v46 = vpop.xlane.xlu0 %605 }
 0x15a   : > { %v361_v21 = vpop.xlane.xlu1 %360  ;;  %v1303_v47 = vpop.xlane.xlu0 %608 }
 0x15b   : > { %937 = vlog2.f32 %v361_v21 }
 0x15e   : > { %v367_v48 = vpop.xlane.xlu1 %366  ;;  %v1305_v30 = vpop.xlane.xlu0 %611 }
 0x15f   : > { %939 = vlog2.f32 %v367_v48  ;;  %v668_v48 = vadd.s32 %v1320_v32, %v651_v45 }
 0x161   : > { %vm685_vm5 = vcmp.lt.s32.totalorder %v668_v48, %v1325_v40 }
 0x162   : > { %v370_v61 = vpop.xlane.xlu1 %369  ;;  %v1307_v25 = vpop.xlane.xlu0 %614 }
 0x163   : > { %941 = vlog2.f32 %v370_v61 }
 0x165   : > { %v938_v28 = vpop.eup %937 }
 0x166   : > { %v379_v0 = vpop.xlane.xlu1 %378  ;;  %v1309_v4 = vpop.xlane.xlu0 %617  ;;  %v407_v35 = vmul.f32 0.6931472, %v938_v28 }
 0x168   : > { %v1334_v43 = vadd.f32 %v407_v35, %v1140_v52  ;;  %v659_v52 = vadd.s32 80, %v1316_v23  ;;  %v655_v35 = vadd.s32 48, %v1316_v23 }
 0x169   : > { %v940_v37 = vpop.eup %939 }
 0x16a   : > { %v385_v29 = vpop.xlane.xlu1 %384  ;;  %v1311_v8 = vpop.xlane.xlu0 %620  ;;  %v411_v44 = vmul.f32 0.6931472, %v940_v37  ;;  %v700_v17 = vsub.f32 %v1334_v43, %v1297_v22 }
 0x16c   : > { %v1351_v21 = vadd.f32 %v411_v44, %v1138_v51  ;;  %v654_v51 = vadd.s32 40, %v1316_v23  ;;  %v716_v33 = vsel %vm684_vm0, %v700_v17, 0.0 }
 0x16d   : > { %v942_v39 = vpop.eup %941 }
 0x16e   : > { %v388_v12 = vpop.xlane.xlu1 %387  ;;  %v1313_v16 = vpop.xlane.xlu0 %623  ;;  %v413_v14 = vmul.f32 0.6931472, %v942_v39  ;;  %v702_v34 = vsub.f32 %v1351_v21, %v1303_v47  ;;  %v671_v47 = vadd.s32 %v1320_v32, %v654_v51  ;;  %v660_v39 = vadd.s32 88, %v1316_v23 }
 0x170   : > { %v1370_v28 = vadd.f32 %v413_v14, %v1144_v54  ;;  %vm688_vm7 = vcmp.lt.s32.totalorder %v671_v47, %v1325_v40  ;;  %v1415_v48 = vadd.s32 %v1320_v32, %v660_v39 }
 0x172   : > { %v391_v19 = vpop.xlane.xlu1 %390  ;;  %v358_v20 = vpop.xlane.xlu0 %357  ;;  %v703_v44 = vsub.f32 %v1370_v28, %v1305_v30  ;;  %v718_v30 = vsel %vm686_vm2, %v702_v34, 0.0  ;;  %vm694_vm11 = vcmp.lt.s32.totalorder %v1415_v48, %v1325_v40  ;;  %vm752_vm2 = vcmask 0  }
 0x173   : > { %943 = vlog2.f32 %v358_v20  ;;  %v1364_v20 = vadd.s32 %v1320_v32, %v658_v9 }
 0x174   : > { %v719_v41 = vsel %vm687_vm3, %v703_v44, 0.0 }
 0x175   : > { %vm692_vm8 = vcmp.lt.s32.totalorder %v1364_v20, %v1325_v40 }
 0x176   : > { %v394_v24 = vpop.xlane.xlu1 %393  ;;  %v364_v27 = vpop.xlane.xlu0 %363 }
 0x177   : > { %945 = vlog2.f32 %v364_v27  ;;  %v1367_v27 = vadd.s32 %v1320_v32, %v659_v52 }
 0x178   : > { %947 = vlog2.f32 %v379_v0 }
 0x179   : > { %vm693_vm9 = vcmp.lt.s32.totalorder %v1367_v27, %v1325_v40 }
 0x17a   : > { %v397_v36 = vpop.xlane.xlu1 %396  ;;  %v373_v63 = vpop.xlane.xlu0 %372 }
 0x17b   : > { %949 = vlog2.f32 %v373_v63 }
 0x17c   : > { %951 = vlog2.f32 %v385_v29  ;;  %v1358_v29 = vadd.s32 %v1320_v32, %v656_v3  ;;  %v672_v3 = vadd.s32 %v1320_v32, %v655_v35 }
 0x17d   : > { %v944_v11 = vpop.eup %943 }
 0x17e   : > { %v400_v1 = vpop.xlane.xlu1 %399  ;;  %v376_v6 = vpop.xlane.xlu0 %375  ;;  %v405_v10 = vmul.f32 0.6931472, %v944_v11  ;;  %vm690_vm6 = vcmp.lt.s32.totalorder %v1358_v29, %v1325_v40  ;;  %vm689_vm10 = vcmp.lt.s32.totalorder %v672_v3, %v1325_v40 }
 0x17f   : > { %953 = vlog2.f32 %v376_v6 }
 0x180   : > { %955 = vlog2.f32 %v388_v12  ;;  %v1346_v13 = vadd.f32 %v405_v10, %v1136_v50 }
 0x181   : > { %v946_v18 = vpop.eup %945  ;;  %957 = vlog2.f32 %v391_v19 }
 0x182   : > { %v403_v61 = vpop.xlane.xlu1 %402  ;;  %v382_v0 = vpop.xlane.xlu0 %381  ;;  %v699_v50 = vsub.f32 %v1346_v13, %v1299_v26  ;;  %v409_v22 = vmul.f32 0.6931472, %v946_v18 }
 0x183   : > { %v948_v12 = vpop.eup %947  ;;  %959 = vlog2.f32 %v382_v0 }
 0x184   : > { %v715_v31 = vsel %vm683_vm4, %v699_v50, 0.0  ;;  %961 = vlog2.f32 %v394_v24  ;;  %v1373_v19 = vadd.f32 %v409_v22, %v1134_v49  ;;  %v419_v37 = vmul.f32 0.6931472, %v948_v12 }
 0x185   : > { %v950_v26 = vpop.eup %949  ;;  %963 = vlog2.f32 %v397_v36  ;;  %v731_v38 = vadd.f32 %v716_v33, %v715_v31 }
 0x186   : > { %v1381_v63 = vpop.xlane.xlu1 %626  ;;  %v1383_v54 = vpop.xlane.xlu0 %629  ;;  %v701_v49 = vsub.f32 %v1373_v19, %v1301_v46  ;;  %v415_v24 = vmul.f32 0.6931472, %v950_v26  ;;  %965 = vlog2.f32 %v400_v1  ;;  %v657_v46 = vadd.s32 64, %v1316_v23 }
 0x187   : > { %v952_v11 = vpop.eup %951  ;;  %967 = vlog2.f32 %v403_v61  ;;  %v661_v1 = vadd.s32 96, %v1316_v23 }
 0x188   : > { %v717_v2 = vsel %vm685_vm5, %v701_v49, 0.0  ;;  %v1394_v45 = vadd.f32 %v415_v24, %v1142_v53  ;;  %v1407_v53 = vadd.f32 %v419_v37, %v1146_v55  ;;  %v423_v55 = vmul.f32 0.6931472, %v952_v11 }
 0x189   : > { %v954_v36 = vpop.eup %953  ;;  %v732_v6 = vadd.f32 %v731_v38, %v717_v2  ;;  %v1428_v51 = vadd.s32 %v1320_v32, %v661_v1  ;;  %v662_v24 = vadd.s32 104, %v1316_v23 }
 0x18a   : > { %v1398_v10 = vpop.xlane.xlu1 %632  ;;  %v1401_v9 = vpop.xlane.xlu0 %635  ;;  %v704_v14 = vsub.f32 %v1394_v45, %v1307_v25  ;;  %v417_v18 = vmul.f32 0.6931472, %v954_v36  ;;  %v674_v25 = vadd.s32 %v1320_v32, %v657_v46 }
 0x18b   : > { %v956_v52 = vpop.eup %955  ;;  %v733_v17 = vadd.f32 %v732_v6, %v718_v30  ;;  %vm695_vm14 = vcmp.lt.s32.totalorder %v1428_v51, %v1325_v40 }
 0x18c   : > { %v958_v61 = vpop.eup %957  ;;  %v1421_v0 = vadd.f32 %v417_v18, %v1148_v56  ;;  %v425_v22 = vmul.f32 0.6931472, %v956_v52  ;;  %v706_v56 = vsub.f32 %v1407_v53, %v1311_v8  ;;  %v720_v33 = vsel %vm688_vm7, %v704_v14, 0.0 }
 0x18d   : > { %v960_v50 = vpop.eup %959  ;;  %v734_v12 = vadd.f32 %v733_v17, %v719_v41  ;;  %v427_v37 = vmul.f32 0.6931472, %v958_v61  ;;  %v1447_v8 = vadd.f32 %v423_v55, %v1150_v57  ;;  %vm691_vm12 = vcmp.lt.s32.totalorder %v674_v25, %v1325_v40 }
 0x18e   : > { %v1430_v31 = vpop.xlane.xlu1 %638  ;;  %v1432_v42 = vpop.xlane.xlu0 %641  ;;  %v705_v34 = vsub.f32 %v1421_v0, %v1309_v4  ;;  %v421_v35 = vmul.f32 0.6931472, %v960_v50  ;;  %v1451_v2 = vadd.f32 %v425_v22, %v1156_v60  ;;  %v663_v14 = vadd.s32 112, %v1316_v23 }
 0x18f   : > { %v962_v26 = vpop.eup %961  ;;  %v735_v49 = vadd.f32 %v734_v12, %v720_v33  ;;  %v708_v6 = vsub.f32 %v1447_v8, %v1381_v63  ;;  %v1472_v30 = vadd.f32 %v427_v37, %v1154_v59 }
 0x190   : > { %v964_v38 = vpop.eup %963  ;;  %v721_v39 = vsel %vm689_vm10, %v705_v34, 0.0  ;;  %v1444_v11 = vadd.f32 %v421_v35, %v1152_v58  ;;  %v429_v47 = vmul.f32 0.6931472, %v962_v26  ;;  %v722_v58 = vsel %vm690_vm6, %v706_v56, 0.0 }
 0x191   : > { %v966_v4 = vpop.eup %965  ;;  %v736_v44 = vadd.f32 %v735_v49, %v721_v39  ;;  %v431_v60 = vmul.f32 0.6931472, %v964_v38  ;;  %v709_v29 = vsub.f32 %v1451_v2, %v1383_v54  ;;  %v710_v61 = vsub.f32 %v1472_v30, %v1398_v10 }
 0x192   : > { %v1453_v46 = vpop.xlane.xlu1 %644  ;;  %v454_v36 = vpop.xlane.xlu0 %453  ;;  %v707_v57 = vsub.f32 %v1444_v11, %v1313_v16  ;;  %v433_v16 = vmul.f32 0.6931472, %v966_v4  ;;  %v1481_v41 = vadd.f32 %v429_v47, %v1164_v5  ;;  %v679_v54 = vadd.s32 %v1320_v32, %v662_v24 }
 0x193   : > { %v500_v3 = vmul.f32 0.0625, %v454_v36  ;;  %v968_v1 = vpop.eup %967  ;;  %v737_v52 = vadd.f32 %v736_v44, %v722_v58  ;;  %v724_v25 = vsel %vm692_vm8, %v708_v6, 0.0  ;;  %v725_v5 = vsel %vm693_vm9, %v709_v29, 0.0 }
 0x194   : > { %v723_v63 = vsel %vm691_vm12, %v707_v57, 0.0  ;;  %v435_v50 = vmul.f32 0.6931472, %v968_v1  ;;  %v1493_v10 = vadd.f32 %v431_v60, %v1160_v62  ;;  %v664_v26 = vadd.s32 120, %v1316_v23 }
 0x195   : > { %v754_v18 = vsub.f32 %v1346_v13, %v500_v3  ;;  %v738_v17 = vadd.f32 %v737_v52, %v723_v63  ;;  %v711_v20 = vsub.f32 %v1481_v41, %v1401_v9  ;;  %v1499_v56 = vadd.f32 %v433_v16, %v1173_v15 }
 0x196   : > { %v457_v55 = vpop.xlane.xlu1 %456  ;;  %v460_v59 = vpop.xlane.xlu0 %459  ;;  %v726_v27 = vsel %vm694_vm11, %v710_v61, 0.0  ;;  %v680_v62 = vadd.s32 %v1320_v32, %v663_v14  ;;  %v712_v15 = vsub.f32 %v1493_v10, %v1430_v31  ;;  %v1512_v9 = vadd.f32 %v435_v50, %v1166_v7 }
 0x197   : > { %771 = vst.msk [vmem:[%s1467_s6] sm:$0xff] %vm770_vm13, %v754_v18  ;;  %v501_v22 = vmul.f32 0.0625, %v457_v55  ;;  %v502_v13 = vmul.f32 0.0625, %v460_v59  ;;  %v739_v12 = vadd.f32 %v738_v17, %v724_v25  ;;  %vm696_vm15 = vcmp.lt.s32.totalorder %v679_v54, %v1325_v40 }
 0x198   : > { %v681_v51 = vadd.s32 %v1320_v32, %v664_v26  ;;  %v727_v49 = vsel %vm695_vm14, %v711_v20, 0.0  ;;  %v713_v31 = vsub.f32 %v1499_v56, %v1432_v42  ;;  %vm697_vm1 = vcmp.lt.s32.totalorder %v680_v62, %v1325_v40 }
 0x199   : > { %v755_v33 = vsub.f32 %v1334_v43, %v501_v22  ;;  %v756_v34 = vsub.f32 %v1373_v19, %v502_v13  ;;  %v740_v35 = vadd.f32 %v739_v12, %v725_v5  ;;  %v728_v47 = vsel %vm696_vm15, %v712_v15, 0.0 }
 0x19a   : > { %v463_v23 = vpop.xlane.xlu1 %462  ;;  %v466_v37 = vpop.xlane.xlu0 %465  ;;  %v714_v44 = vsub.f32 %v1512_v9, %v1453_v46  ;;  %vm698_vm0 = vcmp.lt.s32.totalorder %v681_v51, %v1325_v40 }
 0x19b   : > { %772 = vst.msk [vmem:[%s1467_s6 + $0x8] sm:$0xff] %vm770_vm13, %v755_v33  ;;  %773 = vst.msk [vmem:[%s1467_s6 + $0x10] sm:$0xff] %vm770_vm13, %v756_v34  ;;  %v503_v43 = vmul.f32 0.0625, %v463_v23  ;;  %v504_v19 = vmul.f32 0.0625, %v466_v37  ;;  %v741_v48 = vadd.f32 %v740_v35, %v726_v27 }
 0x19c   : > { %v730_v3 = vsel %vm698_vm0, %v714_v44, 0.0 }
 0x19d   : > { %v757_v7 = vsub.f32 %v1351_v21, %v503_v43  ;;  %v758_v24 = vsub.f32 %v1370_v28, %v504_v19  ;;  %v742_v38 = vadd.f32 %v741_v48, %v727_v49  ;;  %v729_v28 = vsel %vm697_vm1, %v713_v31, 0.0 }
 0x19e   : > { %v469_v39 = vpop.xlane.xlu1 %468  ;;  %v472_v4 = vpop.xlane.xlu0 %471 }
 0x19f   : > { %774 = vst.msk [vmem:[%s1467_s6 + $0x18] sm:$0xff] %vm770_vm13, %v757_v7  ;;  %775 = vst.msk [vmem:[%s1467_s6 + $0x20] sm:$0xff] %vm770_vm13, %v758_v24  ;;  %v505_v32 = vmul.f32 0.0625, %v469_v39  ;;  %v506_v42 = vmul.f32 0.0625, %v472_v4  ;;  %v743_v21 = vadd.f32 %v742_v38, %v728_v47 }
 0x1a1   : > { %v759_v36 = vsub.f32 %v1394_v45, %v505_v32  ;;  %v760_v58 = vsub.f32 %v1421_v0, %v506_v42  ;;  %v744_v57 = vadd.f32 %v743_v21, %v729_v28 }
 0x1a2   : > { %v475_v6 = vpop.xlane.xlu1 %474  ;;  %v478_v46 = vpop.xlane.xlu0 %477 }
 0x1a3   : > { %776 = vst.msk [vmem:[%s1467_s6 + $0x28] sm:$0xff] %vm770_vm13, %v759_v36  ;;  %777 = vst.msk [vmem:[%s1467_s6 + $0x30] sm:$0xff] %vm770_vm13, %v760_v58  ;;  %v507_v1 = vmul.f32 0.0625, %v475_v6  ;;  %v508_v60 = vmul.f32 0.0625, %v478_v46  ;;  %v745_v52 = vadd.f32 %v744_v57, %v730_v3 }
 0x1a5   : > { %v761_v40 = vsub.f32 %v1407_v53, %v507_v1  ;;  %v762_v45 = vsub.f32 %v1444_v11, %v508_v60  ;;  %v746_v0 = vrot.slane %v745_v52, 4 }
 0x1a6   : > { %v481_v29 = vpop.xlane.xlu1 %480  ;;  %v484_v16 = vpop.xlane.xlu0 %483 }
 0x1a7   : > { %778 = vst.msk [vmem:[%s1467_s6 + $0x38] sm:$0xff] %vm770_vm13, %v761_v40  ;;  %779 = vst.msk [vmem:[%s1467_s6 + $0x40] sm:$0xff] %vm770_vm13, %v762_v45  ;;  %v509_v63 = vmul.f32 0.0625, %v481_v29  ;;  %v510_v14 = vmul.f32 0.0625, %v484_v16  ;;  %v747_v18 = vadd.f32 %v746_v0, %v745_v52 }
 0x1a9   : > { %v763_v17 = vsub.f32 %v1447_v8, %v509_v63  ;;  %v764_v53 = vsub.f32 %v1451_v2, %v510_v14  ;;  %v748_v61 = vrot.slane %v747_v18, 2 }
 0x1aa   : > { %v487_v11 = vpop.xlane.xlu1 %486  ;;  %v490_v54 = vpop.xlane.xlu0 %489 }
 0x1ab   : > { %780 = vst.msk [vmem:[%s1467_s6 + $0x48] sm:$0xff] %vm770_vm13, %v763_v17  ;;  %781 = vst.msk [vmem:[%s1467_s6 + $0x50] sm:$0xff] %vm770_vm13, %v764_v53  ;;  %v511_v55 = vmul.f32 0.0625, %v487_v11  ;;  %v512_v59 = vmul.f32 0.0625, %v490_v54  ;;  %v749_v50 = vadd.f32 %v748_v61, %v747_v18 }
 0x1ad   : > { %v765_v25 = vsub.f32 %v1472_v30, %v511_v55  ;;  %v766_v8 = vsub.f32 %v1481_v41, %v512_v59  ;;  %v750_v2 = vrot.slane %v749_v50, 1 }
 0x1ae   : > { %v493_v22 = vpop.xlane.xlu1 %492  ;;  %v496_v13 = vpop.xlane.xlu0 %495 }
 0x1af   : > { %782 = vst.msk [vmem:[%s1467_s6 + $0x58] sm:$0xff] %vm770_vm13, %v765_v25  ;;  %783 = vst.msk [vmem:[%s1467_s6 + $0x60] sm:$0xff] %vm770_vm13, %v766_v8  ;;  %v513_v12 = vmul.f32 0.0625, %v493_v22  ;;  %v514_v5 = vmul.f32 0.0625, %v496_v13  ;;  %v751_v30 = vadd.f32 %v750_v2, %v749_v50 }
 0x1b1   : > { %v767_v26 = vsub.f32 %v1493_v10, %v513_v12  ;;  %v768_v41 = vsub.f32 %v1499_v56, %v514_v5  ;;  %753 = vst.msk [vmem:[%s220_s9] sm:$0x1] %vm752_vm2, %v751_v30 }
 0x1b2   : > { %v499_v20 = vpop.xlane.xlu1 %498 }
 0x1b3   : > { %784 = vst.msk [vmem:[%s1467_s6 + $0x68] sm:$0xff] %vm770_vm13, %v767_v26  ;;  %785 = vst.msk [vmem:[%s1467_s6 + $0x70] sm:$0xff] %vm770_vm13, %v768_v41  ;;  %v515_v33 = vmul.f32 0.0625, %v499_v20 }
 0x1b5   : > { %v769_v34 = vsub.f32 %v1512_v9, %v515_v33 }
 0x1b7   : > { %786 = vst.msk [vmem:[%s1467_s6 + $0x78] sm:$0xff] %vm770_vm13, %v769_v34 }
 0x1b8 PF: > { %s16_s17 = sadd.s32 1, %s975_s17  }
 0x1b9   : > { %p13_p6 = scmp.ge.s32.totalorder %s16_s17, 4  }
 0x1bb   :  { %15 = sbr.rel (!%p13_p6) target bundleno = 2 (0x2), region = 73 }

</bundles_post_ra>
